<compile_context>
chip_gen: v7x
topology: tpu7x:2x2x1
jax: 0.10.0
libtpu: 0.0.40
codegen_flags: <defaults>
</compile_context>

<pallas_src>
import jax
import jax.numpy as jnp
from jax.experimental import pallas as pl
from jax.experimental.pallas import tpu as pltpu

_LANE = 128
_SUBLANE = 16  # covers both f32 (8) and bf16 (16) sublane packing


def _round_up(a: int, b: int) -> int:
    return (a + b - 1) // b * b


def _cdiv(a: int, b: int) -> int:
    return (a + b - 1) // b


def _largest_lane_tile(dim: int, cap: int) -> int:
    """Largest multiple of 128 <= cap that divides `dim` (dim is a 128-multiple)."""
    t = min(_round_up(cap, _LANE), dim)
    t -= t % _LANE
    while dim % t:
        t -= _LANE
    return max(t, _LANE)


def _vmem_budget_bytes() -> int:
    try:
        cap = int(pltpu.get_tpu_info().vmem_capacity_bytes)
    except Exception:
        cap = 64 << 20  # conservative default: v7x per-TensorCore VMEM
    return int(cap * 0.85)  # ~15% headroom for compiler scratch / semaphores


def _pad2d(a, rows, cols, dtype):
    out = jnp.zeros((rows, cols), dtype)
    return out.at[: a.shape[0], : a.shape[1]].set(a.astype(dtype))


# ----------------------------------------------------------------------------
# Fused path: all (padded) weights resident in VMEM, single kernel, row-tiled.
# ----------------------------------------------------------------------------
def _make_fused_kernel(num_layers, compute_dtype):
    def kernel(*refs):
        x_ref = refs[0]
        w_refs = refs[1:1 + num_layers]
        b_refs = refs[1 + num_layers:1 + 2 * num_layers]
        o_ref = refs[1 + 2 * num_layers]

        h = x_ref[...].astype(compute_dtype)   # bf16 opt-in happens here
        for i in range(num_layers):
            acc = jnp.dot(h, w_refs[i][...], preferred_element_type=jnp.float32)
            acc = acc + b_refs[i][...].astype(jnp.float32)      # bias in f32
            if i < num_layers - 1:
                h = jnp.maximum(acc, 0.0).astype(compute_dtype)  # ReLU in f32
            else:
                o_ref[...] = acc.astype(o_ref.dtype)
    return kernel


def _mlp_fused(x2, pws, pbs, *, tm, pdims, out_dtype, compute_dtype, vmem_limit):
    N = x2.shape[0]
    L = len(pws)
    grid_m = _cdiv(N, tm)

    in_specs = [pl.BlockSpec((tm, pdims[0]), lambda i: (i, 0))]
    for w in pws:   # grid-invariant: fetched once, stays resident
        in_specs.append(pl.BlockSpec(w.shape, lambda i: (0, 0)))
    for b in pbs:
        in_specs.append(pl.BlockSpec(b.shape, lambda i: (0, 0)))
    out_spec = pl.BlockSpec((tm, pdims[-1]), lambda i: (i, 0))

    return pl.pallas_call(
        _make_fused_kernel(L, compute_dtype),
        out_shape=jax.ShapeDtypeStruct((N, pdims[-1]), out_dtype),
        grid_spec=pltpu.PrefetchScalarGridSpec(
            num_scalar_prefetch=0,
            grid=(grid_m,),
            in_specs=in_specs,
            out_specs=out_spec,
        ),
        compiler_params=pltpu.CompilerParams(
            dimension_semantics=("parallel",),
            vmem_limit_bytes=vmem_limit,
        ),
    )(x2, *pws, *pbs)


# ----------------------------------------------------------------------------
# Streaming path: one K/N-tiled matmul(+bias,+ReLU) kernel per layer; weights
# are pipelined tile-by-tile from HBM (needed when they exceed the VMEM budget,
# e.g. wide MLPs on v7x's 64 MiB VMEM).
# ----------------------------------------------------------------------------
def _make_linear_kernel(apply_relu):
    def kernel(x_ref, w_ref, b_ref, o_ref, acc_ref):
        @pl.when(pl.program_id(2) == 0)
        def _():
            acc_ref[...] = jnp.zeros_like(acc_ref)

        acc_ref[...] += jnp.dot(x_ref[...].astype(w_ref.dtype), w_ref[...],
                                preferred_element_type=jnp.float32)

        @pl.when(pl.program_id(2) == pl.num_programs(2) - 1)
        def _():
            r = acc_ref[...] + b_ref[...].astype(jnp.float32)
            if apply_relu:
                r = jnp.maximum(r, 0.0)
            o_ref[...] = r.astype(o_ref.dtype)
    return kernel


def _linear_streamed(x2, w, b, *, relu, tm, out_dtype, vmem_limit):
    N = x2.shape[0]
    K, D = w.shape                      # both padded to multiples of 128
    tk = _largest_lane_tile(K, 512)     # must divide K exactly (reduction axis)
    tn = _largest_lane_tile(D, 512)
    grid = (_cdiv(N, tm), D // tn, K // tk)

    return pl.pallas_call(
        _make_linear_kernel(relu),
        out_shape=jax.ShapeDtypeStruct((N, D), out_dtype),
        grid_spec=pltpu.PrefetchScalarGridSpec(
            num_scalar_prefetch=0,
            grid=grid,
            in_specs=[
                pl.BlockSpec((tm, tk), lambda i, j, k: (i, k)),
                pl.BlockSpec((tk, tn), lambda i, j, k: (k, j)),
                pl.BlockSpec((1, tn), lambda i, j, k: (0, j)),
            ],
            out_specs=pl.BlockSpec((tm, tn), lambda i, j, k: (i, j)),
            scratch_shapes=[pltpu.VMEM((tm, tn), jnp.float32)],
        ),
        compiler_params=pltpu.CompilerParams(
            dimension_semantics=("parallel", "parallel", "arbitrary"),
            vmem_limit_bytes=vmem_limit,
        ),
    )(x2, w, b)


# ----------------------------------------------------------------------------
# Wrapper: pad parameters once per model, jit the apply function.
# ----------------------------------------------------------------------------
def make_mlp_pallas(weights, biases, *, matmul_dtype=None, tile_m=512,
                    force_streaming=False):
    """Returns a jitted apply(x) for MLP(x) = Lin_{L-1}(ReLU(...ReLU(Lin_0(x))))."""
    num_layers = len(weights)
    assert len(biases) == num_layers
    dims = [int(weights[0].shape[0])] + [int(w.shape[1]) for w in weights]
    pdims = [_round_up(d, _LANE) for d in dims]
    w_dtype = (jnp.dtype(matmul_dtype) if matmul_dtype is not None
               else jnp.asarray(weights[0]).dtype)

    # Exact zero-padding (zero weight rows/cols, zero bias lanes), done once.
    pws = tuple(_pad2d(jnp.asarray(w), pdims[i], pdims[i + 1], w_dtype)
                for i, w in enumerate(weights))
    pbs = tuple(_pad2d(jnp.asarray(b).reshape(1, -1), 1, pdims[i + 1], jnp.float32)
                for i, b in enumerate(biases))

    @jax.jit
    def apply(x, pws, pbs):
        assert x.shape[-1] == dims[0]
        in_dtype = x.dtype
        compute_dtype = w_dtype
        lead = x.shape[:-1]
        x2 = x.reshape(-1, dims[0])
        N = x2.shape[0]

        # Feature-dim padding only when input_dim is not already lane-aligned;
        # ragged rows are handled by grid clipping (no materialized row padding).
        if pdims[0] != dims[0]:
            x2 = jnp.pad(x2, ((0, 0), (0, pdims[0] - dims[0])))

        itemsize = jnp.dtype(in_dtype).itemsize
        w_itemsize = jnp.dtype(w_dtype).itemsize

        # Row tile: big (amortize ~0.35us/step), multiple of 16, yet small enough
        # that grid_m >= 2 whenever N allows it (v7x dual-TensorCore split).
        tm = max(_SUBLANE, min(_round_up(tile_m, _SUBLANE),
                               _round_up(_cdiv(N, 2), _SUBLANE)))

        budget = _vmem_budget_bytes()
        # Fused footprint: resident padded params (double-buffered blocked specs
        # -> 2x), pipelined I/O tiles, f32 activations (compiler-managed).
        w_bytes = 2 * sum(pdims[i] * pdims[i + 1] for i in range(num_layers)) * w_itemsize
        b_bytes = 2 * sum(8 * p * 4 for p in pdims[1:])
        io_bytes = 2 * tm * (pdims[0] + pdims[-1]) * itemsize
        act_bytes = 2 * tm * max(pdims) * 4
        est = int(1.15 * (w_bytes + b_bytes + io_bytes + act_bytes)) + (2 << 20)
        vmem_limit = budget

        if force_streaming or est > budget:
            h = x2
            for i in range(num_layers):
                last = i == num_layers - 1
                h = _linear_streamed(
                    h, pws[i], pbs[i], relu=not last, tm=tm,
                    out_dtype=in_dtype if last else compute_dtype,
                    vmem_limit=vmem_limit)
        else:
            h = _mlp_fused(x2, pws, pbs, tm=tm, pdims=pdims, out_dtype=in_dtype,
                           compute_dtype=compute_dtype, vmem_limit=vmem_limit)

        out = h[:, :dims[-1]]
        return out.reshape(*lead, dims[-1])

    def call(x):
        return apply(x, pws, pbs)

    return call


# ----------------------------------------------------------------------------
# Reference / init helpers (match the PyTorch module semantics).
# ----------------------------------------------------------------------------
def init_mlp_params(key, input_dim, hidden_dim, output_dim, num_layers):
    """Deterministic init mimicking nn.Linear defaults (stored as [in, out])."""
    weights, biases = [], []
    for i in range(num_layers):
        d_in = input_dim if i == 0 else hidden_dim
        d_out = output_dim if i == num_layers - 1 else hidden_dim
        key, kw, kb = jax.random.split(key, 3)
        bound = 1.0 / (d_in ** 0.5)
        weights.append(jax.random.uniform(kw, (d_in, d_out), jnp.float32, -bound, bound))
        biases.append(jax.random.uniform(kb, (d_out,), jnp.float32, -bound, bound))
    return weights, biases


def mlp_reference(x, weights, biases):
    h = x
    n = len(weights)
    for i, (w, b) in enumerate(zip(weights, biases)):
        h = h @ w + b
        if i < n - 1:
            h = jnp.maximum(h, 0.0)
    return h


if __name__ == "__main__":
    # MLP(input_dim=16, hidden_dim=32, output_dim=8, num_layers=3) on x[2, 8, 16].
    input_dim, hidden_dim, output_dim, num_layers = 16, 32, 8, 3
    batch, seq = 2, 8

    key = jax.random.PRNGKey(0)
    key, kx = jax.random.split(key)
    x = jax.random.normal(kx, (batch, seq, input_dim), dtype=jnp.float32)
    weights, biases = init_mlp_params(key, input_dim, hidden_dim, output_dim, num_layers)

    ref = mlp_reference(x, weights, biases)

    # 1) fused f32 path (module's default precision) -- tight check.
    mlp = make_mlp_pallas(weights, biases)
    out = jax.block_until_ready(mlp(x))
    assert out.shape == (batch, seq, output_dim)
    assert jnp.allclose(out, ref, atol=1e-4, rtol=1e-4), "f32 fused mismatch vs reference"

    # 2) weight-streaming path (auto-selected when weights exceed the VMEM budget,
    #    e.g. wide MLPs on v7x); forced here so it is exercised at small shapes.
    mlp_stream = make_mlp_pallas(weights, biases, force_streaming=True)
    out_s = jax.block_until_ready(mlp_stream(x))
    assert jnp.allclose(out_s, ref, atol=1e-4, rtol=1e-4), "streaming mismatch vs reference"

    # 3) opt-in bf16-matmul path (f32 accumulation / bias / ReLU) -- loose check.
    mlp_bf16 = make_mlp_pallas(weights, biases, matmul_dtype=jnp.bfloat16)
    out_b = jax.block_until_ready(mlp_bf16(x))
    assert jnp.allclose(out_b, ref, atol=5e-2, rtol=5e-2), "bf16 mismatch vs reference"

    print("KERNEL_OK")
</pallas_src>

<mosaic_0001>
module attributes {stable_mosaic.version = 11 : i64} {
  func.func @kernel(%arg0: i32, %arg1: memref<16x128xf32, #tpu.memory_space<vmem>>, %arg2: memref<128x128xf32, #tpu.memory_space<vmem>>, %arg3: memref<128x128xf32, #tpu.memory_space<vmem>>, %arg4: memref<128x128xf32, #tpu.memory_space<vmem>>, %arg5: memref<1x128xf32, #tpu.memory_space<vmem>>, %arg6: memref<1x128xf32, #tpu.memory_space<vmem>>, %arg7: memref<1x128xf32, #tpu.memory_space<vmem>>, %arg8: memref<16x128xf32, #tpu.memory_space<vmem>>) attributes {dimension_semantics = [#tpu.dimension_semantics<parallel>], iteration_bounds = array<i64: 1>, scalar_prefetch = 0 : i64, scratch_operands = 0 : i64, tpu.core_type = #tpu.core_type<tc>, window_params = [{transform_indices = @transform_0, window_bounds = array<i64: 16, 128>}, {pipeline_mode = #tpu.pipeline_mode<synchronous>, transform_indices = @transform_1, window_bounds = array<i64: 128, 128>}, {pipeline_mode = #tpu.pipeline_mode<synchronous>, transform_indices = @transform_2, window_bounds = array<i64: 128, 128>}, {pipeline_mode = #tpu.pipeline_mode<synchronous>, transform_indices = @transform_3, window_bounds = array<i64: 128, 128>}, {pipeline_mode = #tpu.pipeline_mode<synchronous>, transform_indices = @transform_4, window_bounds = array<i64: 1, 128>}, {pipeline_mode = #tpu.pipeline_mode<synchronous>, transform_indices = @transform_5, window_bounds = array<i64: 1, 128>}, {pipeline_mode = #tpu.pipeline_mode<synchronous>, transform_indices = @transform_6, window_bounds = array<i64: 1, 128>}, {transform_indices = @transform_7, window_bounds = array<i64: 16, 128>}]} {
    %c0 = arith.constant 0 : index
    %c0_0 = arith.constant 0 : index
    %0 = vector.load %arg1[%c0, %c0_0] : memref<16x128xf32, #tpu.memory_space<vmem>>, vector<16x128xf32>
    %c0_1 = arith.constant 0 : index
    %c0_2 = arith.constant 0 : index
    %1 = vector.load %arg2[%c0_1, %c0_2] : memref<128x128xf32, #tpu.memory_space<vmem>>, vector<128x128xf32>
    %cst = arith.constant dense<0.000000e+00> : vector<16x128xf32>
    %2 = tpu.matmul %0, %1, %cst {dimension_numbers = #tpu.dot_dimension_numbers<[1], [0], [0], [1], [0, 0, 1, 1], [], []>} : vector<16x128xf32>, vector<128x128xf32>, vector<16x128xf32> -> vector<16x128xf32>
    %c0_3 = arith.constant 0 : index
    %c0_4 = arith.constant 0 : index
    %3 = vector.load %arg5[%c0_3, %c0_4] : memref<1x128xf32, #tpu.memory_space<vmem>>, vector<1x128xf32>
    %4 = vector.broadcast %3 : vector<1x128xf32> to vector<16x128xf32>
    %5 = arith.addf %2, %4 : vector<16x128xf32>
    %cst_5 = arith.constant 0.000000e+00 : f32
    %6 = vector.broadcast %cst_5 : f32 to vector<16x128xf32>
    %7 = arith.maximumf %5, %6 : vector<16x128xf32>
    %c0_6 = arith.constant 0 : index
    %c0_7 = arith.constant 0 : index
    %8 = vector.load %arg3[%c0_6, %c0_7] : memref<128x128xf32, #tpu.memory_space<vmem>>, vector<128x128xf32>
    %cst_8 = arith.constant dense<0.000000e+00> : vector<16x128xf32>
    %9 = tpu.matmul %7, %8, %cst_8 {dimension_numbers = #tpu.dot_dimension_numbers<[1], [0], [0], [1], [0, 0, 1, 1], [], []>} : vector<16x128xf32>, vector<128x128xf32>, vector<16x128xf32> -> vector<16x128xf32>
    %c0_9 = arith.constant 0 : index
    %c0_10 = arith.constant 0 : index
    %10 = vector.load %arg6[%c0_9, %c0_10] : memref<1x128xf32, #tpu.memory_space<vmem>>, vector<1x128xf32>
    %11 = vector.broadcast %10 : vector<1x128xf32> to vector<16x128xf32>
    %12 = arith.addf %9, %11 : vector<16x128xf32>
    %cst_11 = arith.constant 0.000000e+00 : f32
    %13 = vector.broadcast %cst_11 : f32 to vector<16x128xf32>
    %14 = arith.maximumf %12, %13 : vector<16x128xf32>
    %c0_12 = arith.constant 0 : index
    %c0_13 = arith.constant 0 : index
    %15 = vector.load %arg4[%c0_12, %c0_13] : memref<128x128xf32, #tpu.memory_space<vmem>>, vector<128x128xf32>
    %cst_14 = arith.constant dense<0.000000e+00> : vector<16x128xf32>
    %16 = tpu.matmul %14, %15, %cst_14 {dimension_numbers = #tpu.dot_dimension_numbers<[1], [0], [0], [1], [0, 0, 1, 1], [], []>} : vector<16x128xf32>, vector<128x128xf32>, vector<16x128xf32> -> vector<16x128xf32>
    %c0_15 = arith.constant 0 : index
    %c0_16 = arith.constant 0 : index
    %17 = vector.load %arg7[%c0_15, %c0_16] : memref<1x128xf32, #tpu.memory_space<vmem>>, vector<1x128xf32>
    %18 = vector.broadcast %17 : vector<1x128xf32> to vector<16x128xf32>
    %19 = arith.addf %16, %18 : vector<16x128xf32>
    %c0_17 = arith.constant 0 : index
    %c0_18 = arith.constant 0 : index
    %20 = vector.load %arg8[%c0_17, %c0_18] : memref<16x128xf32, #tpu.memory_space<vmem>>, vector<16x128xf32>
    tpu.vector_store %arg8[%c0_17, %c0_18], %19 {strides = array<i32>} : memref<16x128xf32, #tpu.memory_space<vmem>>, vector<16x128xf32>,
    return
  }
  func.func @transform_0(%arg0: i32) -> (i32, i32) {
    %c0_i32 = arith.constant 0 : i32
    %c0_i32_0 = arith.constant 0 : i32
    return %arg0, %c0_i32 : i32, i32
  }
  func.func @transform_1(%arg0: i32) -> (i32, i32) {
    %c0_i32 = arith.constant 0 : i32
    %c0_i32_0 = arith.constant 0 : i32
    %c0_i32_1 = arith.constant 0 : i32
    return %c0_i32, %c0_i32_0 : i32, i32
  }
  func.func @transform_2(%arg0: i32) -> (i32, i32) {
    %c0_i32 = arith.constant 0 : i32
    %c0_i32_0 = arith.constant 0 : i32
    %c0_i32_1 = arith.constant 0 : i32
    return %c0_i32, %c0_i32_0 : i32, i32
  }
  func.func @transform_3(%arg0: i32) -> (i32, i32) {
    %c0_i32 = arith.constant 0 : i32
    %c0_i32_0 = arith.constant 0 : i32
    %c0_i32_1 = arith.constant 0 : i32
    return %c0_i32, %c0_i32_0 : i32, i32
  }
  func.func @transform_4(%arg0: i32) -> (i32, i32) {
    %c0_i32 = arith.constant 0 : i32
    %c0_i32_0 = arith.constant 0 : i32
    %c0_i32_1 = arith.constant 0 : i32
    return %c0_i32, %c0_i32_0 : i32, i32
  }
  func.func @transform_5(%arg0: i32) -> (i32, i32) {
    %c0_i32 = arith.constant 0 : i32
    %c0_i32_0 = arith.constant 0 : i32
    %c0_i32_1 = arith.constant 0 : i32
    return %c0_i32, %c0_i32_0 : i32, i32
  }
  func.func @transform_6(%arg0: i32) -> (i32, i32) {
    %c0_i32 = arith.constant 0 : i32
    %c0_i32_0 = arith.constant 0 : i32
    %c0_i32_1 = arith.constant 0 : i32
    return %c0_i32, %c0_i32_0 : i32, i32
  }
  func.func @transform_7(%arg0: i32) -> (i32, i32) {
    %c0_i32 = arith.constant 0 : i32
    %c0_i32_0 = arith.constant 0 : i32
    return %arg0, %c0_i32 : i32, i32
  }
}

</mosaic_0001>

<bundles_post_ra>
// kernel: apply.1
= control target key start
LH: loop header
LB: loop body
LE: loop exit
PB: predicated region body
PF: predicated region fallthrough
CT: control target
= control target key end

     0   :  { %12 = vsyncpa [#allocation3], 0  ;;  %s826_s0 = inlined_call_operand.vmem [shape: f32[16,128], index: 0, kind: input, shape index: {}]   ;;  %s827_s1 = inlined_call_operand.hbm [shape: f32[128,128], index: 1, kind: input, shape index: {}]   ;;  %s828_s2 = inlined_call_operand.hbm [shape: f32[128,128], index: 2, kind: input, shape index: {}]   ;;  %s829_s3 = inlined_call_operand.hbm [shape: f32[128,128], index: 3, kind: input, shape index: {}]   ;;  %s830_s4 = inlined_call_operand.vmem [shape: f32[1,128], index: 4, kind: input, shape index: {}]   ;;  %s831_s5 = inlined_call_operand.vmem [shape: f32[1,128], index: 5, kind: input, shape index: {}]   ;;  %s832_s6 = inlined_call_operand.vmem [shape: f32[1,128], index: 6, kind: input, shape index: {}]   ;;  %s833_s7 = inlined_call_operand.vmem [shape: f32[16,128], index: 7, kind: output, shape index: {}]  }
   0x1   :  { %13 = vsyncpa [#allocation5], 0  ;;  %s708_s24 = smov [#allocation4]   ;;  %s709_s26 = smov [#allocation2]  }
   0x2   :  { %s33_s25 = sshll.u32 %s708_s24, 4  ;;  %s21_s27 = sshll.u32 %s709_s26, 4  ;;  %s34_s25 = int_to_ptr.vmem [resolvable:$true] %s33_s25  ;;  %s753_s27 = int_to_ptr.vmem [resolvable:$true] %s21_s27 }
   0x3   :  { %s638_s30 = scalar_lea.hbm %s828_s2, 2048 }
   0x4   :  { %p639_p0 = scmp.ne.s32.totalorder %s828_s2, %s638_s30  ;;  %p642_p1 = scmp.lt.u32.totalorder %s638_s30, %s828_s2 }
   0x6   :  { %p644_p2 = pnand %p642_p1, %p639_p0 }
   0x8   :  { %647 = shalt.err (!%p644_p2)
}
   0x9   :  { %s648_s12 = scalar_lea.vmem %s34_s25, 2048  ;;  %p653_p4 = scmp.lt.s32.totalorder %s34_s25, %s34_s25 }
   0xa   :  { %p649_p3 = scmp.ne.s32.totalorder %s34_s25, %s648_s12  ;;  %p654_p5 = scmp.lt.s32.totalorder %s648_s12, %s648_s12 }
   0xc   :  { %p655_p6 = por %p654_p5, %p653_p4 }
   0xe   :  { %p656_p7 = pnand %p655_p6, %p649_p3 }
  0x10   :  { %659 = shalt.err (!%p656_p7)
}
  0x11   :  { %s710_s13 = smov 128   ;;  %s711_s14 = smov 8  }
  0x12   :  { %39 = dma.hbm_to_vmem [thread:$0]  %s828_s2, 2048, %s34_s25, [#allocation5], %s710_s13, %s710_s13, %s711_s14  }
  0x13   :  { %s660_s19 = scalar_lea.hbm %s827_s1, 2048 }
  0x14   :  { %p661_p8 = scmp.ne.s32.totalorder %s827_s1, %s660_s19  ;;  %p664_p9 = scmp.lt.u32.totalorder %s660_s19, %s827_s1 }
  0x16   :  { %p666_p10 = pnand %p664_p9, %p661_p8 }
  0x18   :  { %669 = shalt.err (!%p666_p10)
}
  0x19   :  { %s670_s24 = scalar_lea.vmem %s753_s27, 2048  ;;  %p675_p12 = scmp.lt.s32.totalorder %s753_s27, %s753_s27 }
  0x1a   :  { %p671_p11 = scmp.ne.s32.totalorder %s753_s27, %s670_s24  ;;  %p676_p13 = scmp.lt.s32.totalorder %s670_s24, %s670_s24 }
  0x1c   :  { %p677_p0 = por %p676_p13, %p675_p12 }
  0x1e   :  { %p678_p1 = pnand %p677_p0, %p671_p11 }
  0x20   :  { %681 = shalt.err (!%p678_p1)
}
  0x21   :  { %27 = dma.hbm_to_vmem [thread:$0]  %s827_s1, 2048, %s753_s27, [#allocation3], %s710_s13, %s710_s13, %s711_s14  }
  0x22   :  { %s712_s26 = smov [#allocation6]   ;;  %s682_s8 = scalar_lea.hbm %s829_s3, 2048 }
  0x23   :  { %s45_s28 = sshll.u32 %s712_s26, 4  ;;  %p683_p2 = scmp.ne.s32.totalorder %s829_s3, %s682_s8  ;;  %s46_s28 = int_to_ptr.vmem [resolvable:$true] %s45_s28 }
  0x24   :  { %p686_p3 = scmp.lt.u32.totalorder %s682_s8, %s829_s3 }
  0x26   :  { %p688_p4 = pnand %p686_p3, %p683_p2 }
  0x28   :  { %691 = shalt.err (!%p688_p4)
}
  0x29   :  { %s692_s15 = scalar_lea.vmem %s46_s28, 2048  ;;  %p697_p6 = scmp.lt.s32.totalorder %s46_s28, %s46_s28 }
  0x2a   :  { %p693_p5 = scmp.ne.s32.totalorder %s46_s28, %s692_s15  ;;  %p698_p7 = scmp.lt.s32.totalorder %s692_s15, %s692_s15 }
  0x2c   :  { %p699_p8 = por %p698_p7, %p697_p6 }
  0x2e   :  { %p700_p9 = pnand %p699_p8, %p693_p5 }
  0x30   :  { %703 = shalt.err (!%p700_p9)
}
  0x31   :  { %51 = dma.hbm_to_vmem [thread:$0]  %s829_s3, 2048, %s46_s28, [#allocation5], %s710_s13, %s710_s13, %s711_s14  }
  0x32   :  { %704 = dma.done.wait [#allocation3], 2048  }
  0x33   :  { %705 = vsyncadd [#allocation3], 4294965248 }
  0x34   :  { %706 = dma.done.wait [#allocation5], 4096  }
  0x35   :  { %707 = vsyncadd [#allocation5], 4294963200  ;;  %v69_v0 = vld [vmem:[#allocation2] sm:$0xff]  ;;  %v70_v1 = vld [vmem:[#allocation2 + $0x8] sm:$0xff] }
  0x36   :  { %v71_v2 = vld [vmem:[#allocation2 + $0x10] sm:$0xff]  ;;  %v537_v3 = vpack.c.bf16 %v70_v1, %v69_v0  ;;  %v72_v4 = vld [vmem:[#allocation2 + $0x18] sm:$0xff]  ;;  %v73_v6 = vld [vmem:[#allocation2 + $0x20] sm:$0xff] }
  0x37   :  { %v541_v5 = vpack.c.bf16 %v72_v4, %v71_v2  ;;  %v74_v7 = vld [vmem:[#allocation2 + $0x28] sm:$0xff]  ;;  %v75_v9 = vld [vmem:[#allocation2 + $0x30] sm:$0xff]  ;;  %v76_v10 = vld [vmem:[#allocation2 + $0x38] sm:$0xff] }
  0x38   :  { %538 = vmatprep.subr.bf16.mxu0 %v537_v3  ;;  %v545_v8 = vpack.c.bf16 %v74_v7, %v73_v6  ;;  %v67_v11 = vld [vmem:[%s826_s0] sm:$0xff]  ;;  %v170_v13 = vld [vmem:[#allocation4 + $0x8] sm:$0xff]  ;;  %v171_v14 = vld [vmem:[#allocation4 + $0x10] sm:$0xff]  ;;  %v549_v20 = vpack.c.bf16 %v76_v10, %v75_v9 }
  0x39   :  { %540 = vmatpush3.bf16.msra.mxu0 %v537_v3  ;;  %464 = vmatprep.mubr.f32.mxu0 %v67_v11  ;;  %v169_v12 = vld [vmem:[#allocation4] sm:$0xff]  ;;  %v172_v16 = vld [vmem:[#allocation4 + $0x18] sm:$0xff]  ;;  %v174_v19 = vld [vmem:[#allocation4 + $0x28] sm:$0xff] }
  0x3a   :  { %542 = vmatprep.subr.bf16.mxu0 %v541_v5  ;;  %v569_v15 = vpack.c.bf16 %v170_v13, %v169_v12  ;;  %v573_v17 = vpack.c.bf16 %v172_v16, %v171_v14  ;;  %v173_v18 = vld [vmem:[#allocation4 + $0x20] sm:$0xff]  ;;  %v78_v22 = vld [vmem:[#allocation2 + $0x48] sm:$0xff]  ;;  %v175_v24 = vld [vmem:[#allocation4 + $0x30] sm:$0xff] }
  0x3b   :  { %v77_v21 = vld [vmem:[#allocation2 + $0x40] sm:$0xff]  ;;  %v577_v23 = vpack.c.bf16 %v174_v19, %v173_v18  ;;  %v176_v25 = vld [vmem:[#allocation4 + $0x38] sm:$0xff]  ;;  %v79_v27 = vld [vmem:[#allocation2 + $0x50] sm:$0xff] }
  0x3c   :  { %570 = vmatprep.subr.bf16.mxu1 %v569_v15  ;;  %v553_v26 = vpack.c.bf16 %v78_v22, %v77_v21  ;;  %v80_v28 = vld [vmem:[#allocation2 + $0x58] sm:$0xff]  ;;  %v581_v29 = vpack.c.bf16 %v176_v25, %v175_v24  ;;  %v177_v30 = vld [vmem:[#allocation4 + $0x40] sm:$0xff]  ;;  %v178_v31 = vld [vmem:[#allocation4 + $0x48] sm:$0xff] }
  0x3d   :  { %544 = vmatpush3.bf16.msra.mxu0 %v541_v5  ;;  %572 = vmatpush3.bf16.msra.mxu1 %v569_v15  ;;  %v557_v32 = vpack.c.bf16 %v80_v28, %v79_v27  ;;  %v81_v33 = vld [vmem:[#allocation2 + $0x60] sm:$0xff]  ;;  %v82_v34 = vld [vmem:[#allocation2 + $0x68] sm:$0xff]  ;;  %v585_v35 = vpack.c.bf16 %v178_v31, %v177_v30  ;;  %v179_v36 = vld [vmem:[#allocation4 + $0x50] sm:$0xff] }
  0x3e   :  { %546 = vmatprep.subr.bf16.mxu0 %v545_v8  ;;  %574 = vmatprep.subr.bf16.mxu1 %v573_v17  ;;  %v180_v37 = vld [vmem:[#allocation4 + $0x58] sm:$0xff]  ;;  %v561_v38 = vpack.c.bf16 %v82_v34, %v81_v33  ;;  %v83_v39 = vld [vmem:[#allocation2 + $0x70] sm:$0xff]  ;;  %v181_v42 = vld [vmem:[#allocation4 + $0x60] sm:$0xff] }
  0x3f   :  { %v84_v40 = vld [vmem:[#allocation2 + $0x78] sm:$0xff]  ;;  %v589_v41 = vpack.c.bf16 %v180_v37, %v179_v36  ;;  %v182_v43 = vld [vmem:[#allocation4 + $0x68] sm:$0xff]  ;;  %v183_v47 = vld [vmem:[#allocation4 + $0x70] sm:$0xff] }
  0x40   :  { %v565_v44 = vpack.c.bf16 %v84_v40, %v83_v39  ;;  %v593_v45 = vpack.c.bf16 %v182_v43, %v181_v42  ;;  %v68_v46 = vld [vmem:[%s826_s0 + $0x8] sm:$0xff]  ;;  %v184_v48 = vld [vmem:[#allocation4 + $0x78] sm:$0xff]  ;;  %v269_v50 = vld [vmem:[#allocation6] sm:$0xff] }
  0x41   :  { %548 = vmatpush3.bf16.msra.mxu0 %v545_v8  ;;  %576 = vmatpush3.bf16.msra.mxu1 %v573_v17  ;;  %v597_v49 = vpack.c.bf16 %v184_v48, %v183_v47  ;;  %v270_v51 = vld [vmem:[#allocation6 + $0x8] sm:$0xff]  ;;  %v271_v52 = vld [vmem:[#allocation6 + $0x10] sm:$0xff]  ;;  %v272_v54 = vld [vmem:[#allocation6 + $0x18] sm:$0xff] }
  0x42   :  { %550 = vmatprep.subr.bf16.mxu0 %v549_v20  ;;  %578 = vmatprep.subr.bf16.mxu1 %v577_v23  ;;  %v601_v53 = vpack.c.bf16 %v270_v51, %v269_v50  ;;  %v605_v55 = vpack.c.bf16 %v272_v54, %v271_v52  ;;  %v273_v56 = vld [vmem:[#allocation6 + $0x20] sm:$0xff]  ;;  %v274_v57 = vld [vmem:[#allocation6 + $0x28] sm:$0xff]  ;;  %v275_v59 = vld [vmem:[#allocation6 + $0x30] sm:$0xff] }
  0x43   :  { %v609_v58 = vpack.c.bf16 %v274_v57, %v273_v56  ;;  %v276_v60 = vld [vmem:[#allocation6 + $0x38] sm:$0xff]  ;;  %v277_v62 = vld [vmem:[#allocation6 + $0x40] sm:$0xff]  ;;  %v278_v63 = vld [vmem:[#allocation6 + $0x48] sm:$0xff] }
  0x44   :  { %v613_v61 = vpack.c.bf16 %v276_v60, %v275_v59  ;;  %v617_v0 = vpack.c.bf16 %v278_v63, %v277_v62  ;;  %v279_v1 = vld [vmem:[#allocation6 + $0x50] sm:$0xff]  ;;  %v280_v2 = vld [vmem:[#allocation6 + $0x58] sm:$0xff]  ;;  %v281_v4 = vld [vmem:[#allocation6 + $0x60] sm:$0xff] }
  0x45   :  { %552 = vmatpush3.bf16.msra.mxu0 %v549_v20  ;;  %580 = vmatpush3.bf16.msra.mxu1 %v577_v23  ;;  %v621_v3 = vpack.c.bf16 %v280_v2, %v279_v1  ;;  %v282_v5 = vld [vmem:[#allocation6 + $0x68] sm:$0xff]  ;;  %v375_v7 = vld [vmem:[%s830_s4] ss:$0 sm:$0xff]  ;;  %v283_v14 = vld [vmem:[#allocation6 + $0x70] sm:$0xff] }
  0x46   :  { %554 = vmatprep.subr.bf16.mxu0 %v553_v26  ;;  %582 = vmatprep.subr.bf16.mxu1 %v581_v29  ;;  %v625_v6 = vpack.c.bf16 %v282_v5, %v281_v4  ;;  %v284_v15 = vld [vmem:[#allocation6 + $0x78] sm:$0xff]  ;;  %v376_v17 = vld [vmem:[%s831_s5] ss:$0 sm:$0xff] }
  0x47   :  { %v629_v16 = vpack.c.bf16 %v284_v15, %v283_v14  ;;  %v377_v24 = vld [vmem:[%s832_s6] ss:$0 sm:$0xff] }
  0x49   :  { %556 = vmatpush3.bf16.msra.mxu0 %v553_v26  ;;  %584 = vmatpush3.bf16.msra.mxu1 %v581_v29 }
  0x4a   :  { %558 = vmatprep.subr.bf16.mxu0 %v557_v32  ;;  %586 = vmatprep.subr.bf16.mxu1 %v585_v35 }
  0x4d   :  { %560 = vmatpush3.bf16.msra.mxu0 %v557_v32  ;;  %588 = vmatpush3.bf16.msra.mxu1 %v585_v35 }
  0x4e   :  { %562 = vmatprep.subr.bf16.mxu0 %v561_v38  ;;  %590 = vmatprep.subr.bf16.mxu1 %v589_v41 }
  0x51   :  { %564 = vmatpush3.bf16.msra.mxu0 %v561_v38  ;;  %592 = vmatpush3.bf16.msra.mxu1 %v589_v41 }
  0x52   :  { %566 = vmatprep.subr.bf16.mxu0 %v565_v44  ;;  %594 = vmatprep.subr.bf16.mxu1 %v593_v45 }
  0x55   :  { %568 = vmatpush3.bf16.msra.mxu0 %v565_v44  ;;  %596 = vmatpush3.bf16.msra.mxu1 %v593_v45 }
  0x56   :  { %598 = vmatprep.subr.bf16.mxu1 %v597_v49  ;;  %602 = vmatprep.subr.bf16.mxu0 %v601_v53 }
  0x58   :  { %465 = vmatmul.mubr.f32.vlgmr.msra.gmra.mrb[0].mxu0 %v68_v46 }
  0x59   :  { %600 = vmatpush3.bf16.msra.mxu1 %v597_v49  ;;  %604 = vmatpush3.bf16.msra.mxu0 %v601_v53 }
  0x5a   :  { %606 = vmatprep.subr.bf16.mxu0 %v605_v55 }
  0x5d   :  { %608 = vmatpush3.bf16.msra.mxu0 %v605_v55 }
  0x5e   :  { %610 = vmatprep.subr.bf16.mxu0 %v609_v58 }
  0x61   :  { %612 = vmatpush3.bf16.msra.mxu0 %v609_v58 }
  0x62   :  { %614 = vmatprep.subr.bf16.mxu0 %v613_v61 }
  0x65   :  { %616 = vmatpush3.bf16.msra.mxu0 %v613_v61 }
  0x66   :  { %618 = vmatprep.subr.bf16.mxu0 %v617_v0 }
  0x69   :  { %620 = vmatpush3.bf16.msra.mxu0 %v617_v0 }
  0x6a   :  { %622 = vmatprep.subr.bf16.mxu0 %v621_v3 }
  0x6d   :  { %624 = vmatpush3.bf16.msra.mxu0 %v621_v3 }
  0x6e   :  { %626 = vmatprep.subr.bf16.mxu0 %v625_v6 }
  0x71   :  { %628 = vmatpush3.bf16.msra.mxu0 %v625_v6 }
  0x72   :  { %630 = vmatprep.subr.bf16.mxu0 %v629_v16 }
  0x75   :  { %632 = vmatpush3.bf16.msra.mxu0 %v629_v16 }
 0x12b   :  { %v466_v8 = vpop.f32.mrb[0].mxu0 }
 0x12c   :  { %v164_v9 = vadd.f32 %v466_v8, %v375_v7  ;;  %v158_v10 = vpop.f32.mrb[1].mxu0 }
 0x12d   :  { %v159_v11 = vadd.f32 %v375_v7, %v158_v10 }
 0x12e   :  { %v168_v13 = vmax.f32 %v164_v9, 0.0 }
 0x12f   :  { %v167_v12 = vmax.f32 %v159_v11, 0.0 }
 0x131   :  { %499 = vmatprep.mubr.f32.mxu1 %v167_v12 }
 0x132   :  { %500 = vmatmul.mubr.f32.vlgmr.msra.gmra.mrb[0].mxu1 %v168_v13 }
 0x205   :  { %v501_v18 = vpop.f32.mrb[0].mxu1 }
 0x206   :  { %v264_v19 = vadd.f32 %v501_v18, %v376_v17  ;;  %v258_v20 = vpop.f32.mrb[1].mxu1 }
 0x207   :  { %v259_v21 = vadd.f32 %v376_v17, %v258_v20 }
 0x208   :  { %v268_v23 = vmax.f32 %v264_v19, 0.0 }
 0x209   :  { %v267_v22 = vmax.f32 %v259_v21, 0.0 }
 0x20b   :  { %534 = vmatprep.mubr.f32.mxu0 %v267_v22 }
 0x20c   :  { %535 = vmatmul.mubr.f32.vlgmr.msra.gmra.mrb[2].mxu0 %v268_v23 }
 0x2df   :  { %v536_v25 = vpop.f32.mrb[2].mxu0 }
 0x2e0   :  { %v364_v26 = vadd.f32 %v536_v25, %v377_v24  ;;  %v358_v27 = vpop.f32.mrb[3].mxu0 }
 0x2e1   :  { %v359_v28 = vadd.f32 %v377_v24, %v358_v27 }
 0x2e2   :  { %368 = vst [vmem:[%s833_s7 + $0x8] sm:$0xff] %v364_v26 }
 0x2e3   :  { %367 = vst [vmem:[%s833_s7] sm:$0xff] %v359_v28 }
 0x2e4   :  { %373 = vsyncpa [#allocation3], 1 }
 0x2e5   :  { %374 = vsyncpa [#allocation5], 1 }

</bundles_post_ra>
